<compile_context>
chip_gen: v5e
topology: v5e:2x2
jax: 0.10.0
libtpu: 0.0.40
codegen_flags: <defaults>
</compile_context>

<pallas_src>
import functools

import numpy as np
import jax
import jax.numpy as jnp
from jax import lax
from jax.experimental import pallas as pl
from jax.experimental.pallas import tpu as pltpu

EPS = 1e-5
LANE = 128


def encoder_block_kernel(x_ref, w1_ref, g1_ref, be1_ref, w2_ref, g2_ref, be2_ref,
                         mask_ref, feat_ref, pool_ref, h1p_ref,
                         *, n_batch, k_size, pad, l_valid, lpad, r_mid, l_pool):
    """Fused Conv-BN-ReLU x2 + MaxPool1d(2); whole (small) problem per call.

    x_ref    : (R, Cin_p)         zero-padded input slab, R = N * (L + 2*pad)
    w1_ref   : (K, Cin_p, Cout_p) tap-major conv1 weights
    w2_ref   : (K, Cout_p, Cout_p) tap-major conv2 weights
    g/be     : (1, Cout_p)        BN gamma / beta (channel-padded)
    mask_ref : (R_mid, 1)         1.0 on real data rows, 0.0 on pad rows
    feat_ref : (R_mid, Cout_p)    pre-pool features ("mid" slab rows [pad, R-pad))
    pool_ref : (N*L//2, Cout_p)   MaxPool1d(2) output
    h1p_ref  : (R, Cout_p)        VMEM scratch: zero-padded BN1+ReLU activations
    """
    coutp = feat_ref.shape[-1]
    count = float(n_batch * l_valid)
    mask = mask_ref[...]                                   # (R_mid, 1)

    # ---- conv1: one full-slab (all batches at once) matmul per tap ----------
    c1 = jnp.dot(x_ref[pl.ds(0, r_mid), :], w1_ref[0],
                 preferred_element_type=jnp.float32)
    for k in range(1, k_size):
        c1 = c1 + jnp.dot(x_ref[pl.ds(k, r_mid), :], w1_ref[k],
                          preferred_element_type=jnp.float32)
    # conv1 bias omitted: train-mode BN subtracts the batch mean right after,
    # so the bias cancels exactly.

    # ---- BN1 (batch statistics over valid rows only, two-pass) + ReLU -------
    mean1 = jnp.sum(c1 * mask, axis=0, keepdims=True) / count
    cent1 = (c1 - mean1) * mask
    var1 = jnp.sum(cent1 * cent1, axis=0, keepdims=True) / count
    scale1 = g1_ref[...] * lax.rsqrt(var1 + EPS)
    shift1 = be1_ref[...] - mean1 * scale1
    # mask -> pad rows are exactly 0, which is conv2's "same" zero padding.
    h1 = jnp.maximum(c1 * scale1 + shift1, 0.0) * mask

    # ---- stage h1 in the padded scratch (interior written once, edges only) -
    if pad:
        h1p_ref[pl.ds(0, pad), :] = jnp.zeros((pad, coutp), jnp.float32)
        h1p_ref[pl.ds(pad + r_mid, pad), :] = jnp.zeros((pad, coutp), jnp.float32)
    h1p_ref[pl.ds(pad, r_mid), :] = h1

    # ---- conv2: one full-slab matmul per tap (contraction depth = Cout_p) ---
    c2 = jnp.dot(h1p_ref[pl.ds(0, r_mid), :], w2_ref[0],
                 preferred_element_type=jnp.float32)
    for k in range(1, k_size):
        c2 = c2 + jnp.dot(h1p_ref[pl.ds(k, r_mid), :], w2_ref[k],
                          preferred_element_type=jnp.float32)

    # ---- BN2 + ReLU; feature output written exactly once ---------------------
    mean2 = jnp.sum(c2 * mask, axis=0, keepdims=True) / count
    cent2 = (c2 - mean2) * mask
    var2 = jnp.sum(cent2 * cent2, axis=0, keepdims=True) / count
    scale2 = g2_ref[...] * lax.rsqrt(var2 + EPS)
    shift2 = be2_ref[...] - mean2 * scale2
    f = jnp.maximum(c2 * scale2 + shift2, 0.0)
    feat_ref[...] = f          # pad rows hold don't-care values; wrapper slices.

    # ---- MaxPool1d(2) from the in-register value (static slices only) --------
    rows = []
    for n in range(n_batch):
        base = n * lpad                      # batch n's data rows in "mid" coords
        for j in range(l_pool):
            a = f[base + 2 * j: base + 2 * j + 1, :]
            b = f[base + 2 * j + 1: base + 2 * j + 2, :]
            rows.append(jnp.maximum(a, b))
    pool_ref[...] = jnp.concatenate(rows, axis=0)


def encoder_block(x_ncl, params):
    """PyTorch-layout (N, C, L) in / out wrapper around the Pallas kernel."""
    w1, b1, g1, be1, w2, b2, g2, be2 = params   # b1/b2 unused: cancelled by BN
    n, cin, l = x_ncl.shape
    cout, _, k = w1.shape
    assert k % 2 == 1, "same-padding Conv1d with even kernel not supported"
    pad = k // 2
    lpad = l + 2 * pad
    r = n * lpad
    r_mid = r - 2 * pad
    l_pool = l // 2
    cinp = -(-cin // LANE) * LANE
    coutp = -(-cout // LANE) * LANE
    f32 = jnp.float32

    # Input slab: (N*Lpad, Cin_p), zero rows between batches, channels on lanes.
    x_nlc = jnp.transpose(x_ncl, (0, 2, 1)).astype(f32)
    x_slab = jnp.pad(x_nlc, ((0, 0), (pad, pad), (0, cinp - cin))).reshape(r, cinp)

    # Tap-major, channel-padded weights.
    w1_k = jnp.pad(jnp.transpose(w1, (2, 1, 0)).astype(f32),
                   ((0, 0), (0, cinp - cin), (0, coutp - cout)))
    w2_k = jnp.pad(jnp.transpose(w2, (2, 1, 0)).astype(f32),
                   ((0, 0), (0, coutp - cout), (0, coutp - cout)))

    def crow(v, fill):
        return jnp.pad(v.astype(f32), (0, coutp - cout),
                       constant_values=fill).reshape(1, coutp)

    g1p, be1p = crow(g1, 1.0), crow(be1, 0.0)
    g2p, be2p = crow(g2, 1.0), crow(be2, 0.0)

    # Row-validity mask over the "mid" slab rows (excludes conv zero-pad rows).
    local = (jnp.arange(r_mid) + pad) % lpad
    mask = ((local >= pad) & (local < pad + l)).astype(f32).reshape(r_mid, 1)

    kern = functools.partial(encoder_block_kernel, n_batch=n, k_size=k, pad=pad,
                             l_valid=l, lpad=lpad, r_mid=r_mid, l_pool=l_pool)

    feat_rows, pool_rows = pl.pallas_call(
        kern,
        grid=(1,),
        in_specs=[
            pl.BlockSpec((r, cinp), lambda i: (0, 0)),
            pl.BlockSpec((k, cinp, coutp), lambda i: (0, 0, 0)),
            pl.BlockSpec((1, coutp), lambda i: (0, 0)),
            pl.BlockSpec((1, coutp), lambda i: (0, 0)),
            pl.BlockSpec((k, coutp, coutp), lambda i: (0, 0, 0)),
            pl.BlockSpec((1, coutp), lambda i: (0, 0)),
            pl.BlockSpec((1, coutp), lambda i: (0, 0)),
            pl.BlockSpec((r_mid, 1), lambda i: (0, 0)),
        ],
        out_specs=[
            pl.BlockSpec((r_mid, coutp), lambda i: (0, 0)),
            pl.BlockSpec((n * l_pool, coutp), lambda i: (0, 0)),
        ],
        out_shape=[
            jax.ShapeDtypeStruct((r_mid, coutp), f32),
            jax.ShapeDtypeStruct((n * l_pool, coutp), f32),
        ],
        scratch_shapes=[pltpu.VMEM((r, coutp), f32)],
        compiler_params=pltpu.CompilerParams(
            dimension_semantics=("arbitrary",),
            vmem_limit_bytes=32 * 1024 * 1024),
    )(x_slab, w1_k, g1p, be1p, w2_k, g2p, be2p, mask)

    # Drop pad rows / pad channels; back to PyTorch NCL layout.
    feat_nlc = jnp.stack([feat_rows[i * lpad:i * lpad + l, :cout]
                          for i in range(n)], axis=0)              # (N, L, Cout)
    feat = jnp.transpose(feat_nlc, (0, 2, 1))                       # (N, Cout, L)
    pooled = jnp.transpose(
        pool_rows.reshape(n, l_pool, coutp)[:, :, :cout], (0, 2, 1))
    return pooled, feat


def ref_forward(x, params):
    """Pure-JAX reference matching PyTorch EncoderBlock.forward (train mode)."""
    w1, b1, g1, be1, w2, b2, g2, be2 = params

    def conv_bn_relu(h, w, b, g, be):
        kk = w.shape[-1]
        y = lax.conv_general_dilated(h, w, window_strides=(1,),
                                     padding=[(kk // 2, kk // 2)],
                                     dimension_numbers=('NCH', 'OIH', 'NCH'))
        y = y + b[None, :, None]
        mean = jnp.mean(y, axis=(0, 2), keepdims=True)
        var = jnp.mean((y - mean) ** 2, axis=(0, 2), keepdims=True)
        y = (y - mean) / jnp.sqrt(var + EPS)
        return jnp.maximum(y * g[None, :, None] + be[None, :, None], 0.0)

    f = conv_bn_relu(x, w1, b1, g1, be1)
    f = conv_bn_relu(f, w2, b2, g2, be2)
    nn_, cc_, ll_ = f.shape
    pooled = jnp.max(f.reshape(nn_, cc_, ll_ // 2, 2), axis=-1)
    return pooled, f


if __name__ == "__main__":
    N, C_IN, C_OUT, L, K = 2, 4, 8, 16, 3

    key = jax.random.PRNGKey(0)
    ks = jax.random.split(key, 9)
    x = jax.random.normal(ks[0], (N, C_IN, L), jnp.float32)
    w1 = 0.3 * jax.random.normal(ks[1], (C_OUT, C_IN, K), jnp.float32)
    b1 = 0.1 * jax.random.normal(ks[2], (C_OUT,), jnp.float32)
    g1 = 1.0 + 0.1 * jax.random.normal(ks[3], (C_OUT,), jnp.float32)
    be1 = 0.1 * jax.random.normal(ks[4], (C_OUT,), jnp.float32)
    w2 = 0.3 * jax.random.normal(ks[5], (C_OUT, C_OUT, K), jnp.float32)
    b2 = 0.1 * jax.random.normal(ks[6], (C_OUT,), jnp.float32)
    g2 = 1.0 + 0.1 * jax.random.normal(ks[7], (C_OUT,), jnp.float32)
    be2 = 0.1 * jax.random.normal(ks[8], (C_OUT,), jnp.float32)
    params = (w1, b1, g1, be1, w2, b2, g2, be2)

    pooled, feat = jax.block_until_ready(encoder_block(x, params))

    assert pooled.shape == (N, C_OUT, L // 2), pooled.shape
    assert feat.shape == (N, C_OUT, L), feat.shape

    pooled_ref, feat_ref = ref_forward(x, params)
    np.testing.assert_allclose(np.asarray(feat), np.asarray(feat_ref),
                               rtol=2e-3, atol=2e-3)
    np.testing.assert_allclose(np.asarray(pooled), np.asarray(pooled_ref),
                               rtol=2e-3, atol=2e-3)

    print("KERNEL_OK")
</pallas_src>

<mosaic_0001>
module attributes {stable_mosaic.version = 11 : i64} {
  func.func @encoder_block_kernel(%arg0: i32, %arg1: memref<36x128xf32, #tpu.memory_space<vmem>>, %arg2: memref<3x128x128xf32, #tpu.memory_space<vmem>>, %arg3: memref<1x128xf32, #tpu.memory_space<vmem>>, %arg4: memref<1x128xf32, #tpu.memory_space<vmem>>, %arg5: memref<3x128x128xf32, #tpu.memory_space<vmem>>, %arg6: memref<1x128xf32, #tpu.memory_space<vmem>>, %arg7: memref<1x128xf32, #tpu.memory_space<vmem>>, %arg8: memref<34x1xf32, #tpu.memory_space<vmem>>, %arg9: memref<34x128xf32, #tpu.memory_space<vmem>>, %arg10: memref<16x128xf32, #tpu.memory_space<vmem>>, %arg11: memref<36x128xf32, #tpu.memory_space<vmem>>) attributes {dimension_semantics = [#tpu.dimension_semantics<arbitrary>], iteration_bounds = array<i64: 1>, scalar_prefetch = 0 : i64, scratch_operands = 1 : i64, tpu.core_type = #tpu.core_type<tc>, window_params = [{pipeline_mode = #tpu.pipeline_mode<synchronous>, transform_indices = @transform_0, window_bounds = array<i64: 36, 128>}, {pipeline_mode = #tpu.pipeline_mode<synchronous>, transform_indices = @transform_1, window_bounds = array<i64: 3, 128, 128>}, {pipeline_mode = #tpu.pipeline_mode<synchronous>, transform_indices = @transform_2, window_bounds = array<i64: 1, 128>}, {pipeline_mode = #tpu.pipeline_mode<synchronous>, transform_indices = @transform_3, window_bounds = array<i64: 1, 128>}, {pipeline_mode = #tpu.pipeline_mode<synchronous>, transform_indices = @transform_4, window_bounds = array<i64: 3, 128, 128>}, {pipeline_mode = #tpu.pipeline_mode<synchronous>, transform_indices = @transform_5, window_bounds = array<i64: 1, 128>}, {pipeline_mode = #tpu.pipeline_mode<synchronous>, transform_indices = @transform_6, window_bounds = array<i64: 1, 128>}, {pipeline_mode = #tpu.pipeline_mode<synchronous>, transform_indices = @transform_7, window_bounds = array<i64: 34, 1>}, {pipeline_mode = #tpu.pipeline_mode<synchronous>, transform_indices = @transform_8, window_bounds = array<i64: 34, 128>}, {pipeline_mode = #tpu.pipeline_mode<synchronous>, transform_indices = @transform_9, window_bounds = array<i64: 16, 128>}]} {
    %c0 = arith.constant 0 : index
    %c0_0 = arith.constant 0 : index
    %0 = vector.load %arg8[%c0, %c0_0] : memref<34x1xf32, #tpu.memory_space<vmem>>, vector<34x1xf32>
    %c0_1 = arith.constant 0 : index
    %c0_2 = arith.constant 0 : index
    %1 = vector.load %arg1[%c0_1, %c0_2] : memref<36x128xf32, #tpu.memory_space<vmem>>, vector<34x128xf32>
    %c0_3 = arith.constant 0 : index
    %c0_4 = arith.constant 0 : index
    %c0_5 = arith.constant 0 : index
    %2 = vector.load %arg2[%c0_3, %c0_4, %c0_5] : memref<3x128x128xf32, #tpu.memory_space<vmem>>, vector<1x128x128xf32>
    %3 = vector.shape_cast %2 : vector<1x128x128xf32> to vector<128x128xf32>
    %cst = arith.constant dense<0.000000e+00> : vector<34x128xf32>
    %4 = tpu.matmul %1, %3, %cst {dimension_numbers = #tpu.dot_dimension_numbers<[1], [0], [0], [1], [0, 0, 1, 1], [], []>} : vector<34x128xf32>, vector<128x128xf32>, vector<34x128xf32> -> vector<34x128xf32>
    %c1 = arith.constant 1 : index
    %c0_6 = arith.constant 0 : index
    %5 = vector.load %arg1[%c1, %c0_6] : memref<36x128xf32, #tpu.memory_space<vmem>>, vector<34x128xf32>
    %c1_7 = arith.constant 1 : index
    %c0_8 = arith.constant 0 : index
    %c0_9 = arith.constant 0 : index
    %6 = vector.load %arg2[%c1_7, %c0_8, %c0_9] : memref<3x128x128xf32, #tpu.memory_space<vmem>>, vector<1x128x128xf32>
    %7 = vector.shape_cast %6 : vector<1x128x128xf32> to vector<128x128xf32>
    %cst_10 = arith.constant dense<0.000000e+00> : vector<34x128xf32>
    %8 = tpu.matmul %5, %7, %cst_10 {dimension_numbers = #tpu.dot_dimension_numbers<[1], [0], [0], [1], [0, 0, 1, 1], [], []>} : vector<34x128xf32>, vector<128x128xf32>, vector<34x128xf32> -> vector<34x128xf32>
    %9 = arith.addf %4, %8 : vector<34x128xf32>
    %c2 = arith.constant 2 : index
    %c0_11 = arith.constant 0 : index
    %10 = vector.load %arg1[%c2, %c0_11] : memref<36x128xf32, #tpu.memory_space<vmem>>, vector<34x128xf32>
    %c2_12 = arith.constant 2 : index
    %c0_13 = arith.constant 0 : index
    %c0_14 = arith.constant 0 : index
    %11 = vector.load %arg2[%c2_12, %c0_13, %c0_14] : memref<3x128x128xf32, #tpu.memory_space<vmem>>, vector<1x128x128xf32>
    %12 = vector.shape_cast %11 : vector<1x128x128xf32> to vector<128x128xf32>
    %cst_15 = arith.constant dense<0.000000e+00> : vector<34x128xf32>
    %13 = tpu.matmul %10, %12, %cst_15 {dimension_numbers = #tpu.dot_dimension_numbers<[1], [0], [0], [1], [0, 0, 1, 1], [], []>} : vector<34x128xf32>, vector<128x128xf32>, vector<34x128xf32> -> vector<34x128xf32>
    %14 = arith.addf %9, %13 : vector<34x128xf32>
    %15 = vector.broadcast %0 : vector<34x1xf32> to vector<34x128xf32>
    %16 = arith.mulf %14, %15 : vector<34x128xf32>
    %cst_16 = arith.constant dense<0.000000e+00> : vector<128xf32>
    %17 = vector.multi_reduction <add>, %16, %cst_16 [0] : vector<34x128xf32> to vector<128xf32>
    %18 = vector.shape_cast %17 : vector<128xf32> to vector<1x128xf32>
    %cst_17 = arith.constant 3.200000e+01 : f32
    %19 = vector.broadcast %cst_17 : f32 to vector<1x128xf32>
    %20 = arith.divf %18, %19 : vector<1x128xf32>
    %21 = vector.broadcast %20 : vector<1x128xf32> to vector<34x128xf32>
    %22 = arith.subf %14, %21 : vector<34x128xf32>
    %23 = vector.broadcast %0 : vector<34x1xf32> to vector<34x128xf32>
    %24 = arith.mulf %22, %23 : vector<34x128xf32>
    %25 = arith.mulf %24, %24 : vector<34x128xf32>
    %cst_18 = arith.constant dense<0.000000e+00> : vector<128xf32>
    %26 = vector.multi_reduction <add>, %25, %cst_18 [0] : vector<34x128xf32> to vector<128xf32>
    %27 = vector.shape_cast %26 : vector<128xf32> to vector<1x128xf32>
    %cst_19 = arith.constant 3.200000e+01 : f32
    %28 = vector.broadcast %cst_19 : f32 to vector<1x128xf32>
    %29 = arith.divf %27, %28 : vector<1x128xf32>
    %c0_20 = arith.constant 0 : index
    %c0_21 = arith.constant 0 : index
    %30 = vector.load %arg3[%c0_20, %c0_21] : memref<1x128xf32, #tpu.memory_space<vmem>>, vector<1x128xf32>
    %cst_22 = arith.constant 9.99999974E-6 : f32
    %31 = vector.broadcast %cst_22 : f32 to vector<1x128xf32>
    %32 = arith.addf %29, %31 : vector<1x128xf32>
    %33 = math.rsqrt %32 : vector<1x128xf32>
    %34 = arith.mulf %30, %33 : vector<1x128xf32>
    %c0_23 = arith.constant 0 : index
    %c0_24 = arith.constant 0 : index
    %35 = vector.load %arg4[%c0_23, %c0_24] : memref<1x128xf32, #tpu.memory_space<vmem>>, vector<1x128xf32>
    %36 = arith.mulf %20, %34 : vector<1x128xf32>
    %37 = arith.subf %35, %36 : vector<1x128xf32>
    %38 = vector.broadcast %34 : vector<1x128xf32> to vector<34x128xf32>
    %39 = arith.mulf %14, %38 : vector<34x128xf32>
    %40 = vector.broadcast %37 : vector<1x128xf32> to vector<34x128xf32>
    %41 = arith.addf %39, %40 : vector<34x128xf32>
    %cst_25 = arith.constant 0.000000e+00 : f32
    %42 = vector.broadcast %cst_25 : f32 to vector<34x128xf32>
    %43 = arith.maximumf %41, %42 : vector<34x128xf32>
    %44 = vector.broadcast %0 : vector<34x1xf32> to vector<34x128xf32>
    %45 = arith.mulf %43, %44 : vector<34x128xf32>
    %cst_26 = arith.constant 0.000000e+00 : f32
    %46 = vector.broadcast %cst_26 : f32 to vector<1x128xf32>
    %c0_27 = arith.constant 0 : index
    %c0_28 = arith.constant 0 : index
    %47 = vector.load %arg11[%c0_27, %c0_28] : memref<36x128xf32, #tpu.memory_space<vmem>>, vector<1x128xf32>
    tpu.vector_store %arg11[%c0_27, %c0_28], %46 {strides = array<i32>} : memref<36x128xf32, #tpu.memory_space<vmem>>, vector<1x128xf32>,
    %cst_29 = arith.constant 0.000000e+00 : f32
    %48 = vector.broadcast %cst_29 : f32 to vector<1x128xf32>
    %c35 = arith.constant 35 : index
    %c0_30 = arith.constant 0 : index
    %49 = vector.load %arg11[%c35, %c0_30] : memref<36x128xf32, #tpu.memory_space<vmem>>, vector<1x128xf32>
    tpu.vector_store %arg11[%c35, %c0_30], %48 {strides = array<i32>} : memref<36x128xf32, #tpu.memory_space<vmem>>, vector<1x128xf32>,
    %c1_31 = arith.constant 1 : index
    %c0_32 = arith.constant 0 : index
    %50 = vector.load %arg11[%c1_31, %c0_32] : memref<36x128xf32, #tpu.memory_space<vmem>>, vector<34x128xf32>
    tpu.vector_store %arg11[%c1_31, %c0_32], %45 {strides = array<i32>} : memref<36x128xf32, #tpu.memory_space<vmem>>, vector<34x128xf32>,
    %c0_33 = arith.constant 0 : index
    %c0_34 = arith.constant 0 : index
    %51 = vector.load %arg11[%c0_33, %c0_34] : memref<36x128xf32, #tpu.memory_space<vmem>>, vector<34x128xf32>
    %c0_35 = arith.constant 0 : index
    %c0_36 = arith.constant 0 : index
    %c0_37 = arith.constant 0 : index
    %52 = vector.load %arg5[%c0_35, %c0_36, %c0_37] : memref<3x128x128xf32, #tpu.memory_space<vmem>>, vector<1x128x128xf32>
    %53 = vector.shape_cast %52 : vector<1x128x128xf32> to vector<128x128xf32>
    %cst_38 = arith.constant dense<0.000000e+00> : vector<34x128xf32>
    %54 = tpu.matmul %51, %53, %cst_38 {dimension_numbers = #tpu.dot_dimension_numbers<[1], [0], [0], [1], [0, 0, 1, 1], [], []>} : vector<34x128xf32>, vector<128x128xf32>, vector<34x128xf32> -> vector<34x128xf32>
    %c1_39 = arith.constant 1 : index
    %c0_40 = arith.constant 0 : index
    %55 = vector.load %arg11[%c1_39, %c0_40] : memref<36x128xf32, #tpu.memory_space<vmem>>, vector<34x128xf32>
    %c1_41 = arith.constant 1 : index
    %c0_42 = arith.constant 0 : index
    %c0_43 = arith.constant 0 : index
    %56 = vector.load %arg5[%c1_41, %c0_42, %c0_43] : memref<3x128x128xf32, #tpu.memory_space<vmem>>, vector<1x128x128xf32>
    %57 = vector.shape_cast %56 : vector<1x128x128xf32> to vector<128x128xf32>
    %cst_44 = arith.constant dense<0.000000e+00> : vector<34x128xf32>
    %58 = tpu.matmul %55, %57, %cst_44 {dimension_numbers = #tpu.dot_dimension_numbers<[1], [0], [0], [1], [0, 0, 1, 1], [], []>} : vector<34x128xf32>, vector<128x128xf32>, vector<34x128xf32> -> vector<34x128xf32>
    %59 = arith.addf %54, %58 : vector<34x128xf32>
    %c2_45 = arith.constant 2 : index
    %c0_46 = arith.constant 0 : index
    %60 = vector.load %arg11[%c2_45, %c0_46] : memref<36x128xf32, #tpu.memory_space<vmem>>, vector<34x128xf32>
    %c2_47 = arith.constant 2 : index
    %c0_48 = arith.constant 0 : index
    %c0_49 = arith.constant 0 : index
    %61 = vector.load %arg5[%c2_47, %c0_48, %c0_49] : memref<3x128x128xf32, #tpu.memory_space<vmem>>, vector<1x128x128xf32>
    %62 = vector.shape_cast %61 : vector<1x128x128xf32> to vector<128x128xf32>
    %cst_50 = arith.constant dense<0.000000e+00> : vector<34x128xf32>
    %63 = tpu.matmul %60, %62, %cst_50 {dimension_numbers = #tpu.dot_dimension_numbers<[1], [0], [0], [1], [0, 0, 1, 1], [], []>} : vector<34x128xf32>, vector<128x128xf32>, vector<34x128xf32> -> vector<34x128xf32>
    %64 = arith.addf %59, %63 : vector<34x128xf32>
    %65 = vector.broadcast %0 : vector<34x1xf32> to vector<34x128xf32>
    %66 = arith.mulf %64, %65 : vector<34x128xf32>
    %cst_51 = arith.constant dense<0.000000e+00> : vector<128xf32>
    %67 = vector.multi_reduction <add>, %66, %cst_51 [0] : vector<34x128xf32> to vector<128xf32>
    %68 = vector.shape_cast %67 : vector<128xf32> to vector<1x128xf32>
    %cst_52 = arith.constant 3.200000e+01 : f32
    %69 = vector.broadcast %cst_52 : f32 to vector<1x128xf32>
    %70 = arith.divf %68, %69 : vector<1x128xf32>
    %71 = vector.broadcast %70 : vector<1x128xf32> to vector<34x128xf32>
    %72 = arith.subf %64, %71 : vector<34x128xf32>
    %73 = vector.broadcast %0 : vector<34x1xf32> to vector<34x128xf32>
    %74 = arith.mulf %72, %73 : vector<34x128xf32>
    %75 = arith.mulf %74, %74 : vector<34x128xf32>
    %cst_53 = arith.constant dense<0.000000e+00> : vector<128xf32>
    %76 = vector.multi_reduction <add>, %75, %cst_53 [0] : vector<34x128xf32> to vector<128xf32>
    %77 = vector.shape_cast %76 : vector<128xf32> to vector<1x128xf32>
    %cst_54 = arith.constant 3.200000e+01 : f32
    %78 = vector.broadcast %cst_54 : f32 to vector<1x128xf32>
    %79 = arith.divf %77, %78 : vector<1x128xf32>
    %c0_55 = arith.constant 0 : index
    %c0_56 = arith.constant 0 : index
    %80 = vector.load %arg6[%c0_55, %c0_56] : memref<1x128xf32, #tpu.memory_space<vmem>>, vector<1x128xf32>
    %cst_57 = arith.constant 9.99999974E-6 : f32
    %81 = vector.broadcast %cst_57 : f32 to vector<1x128xf32>
    %82 = arith.addf %79, %81 : vector<1x128xf32>
    %83 = math.rsqrt %82 : vector<1x128xf32>
    %84 = arith.mulf %80, %83 : vector<1x128xf32>
    %c0_58 = arith.constant 0 : index
    %c0_59 = arith.constant 0 : index
    %85 = vector.load %arg7[%c0_58, %c0_59] : memref<1x128xf32, #tpu.memory_space<vmem>>, vector<1x128xf32>
    %86 = arith.mulf %70, %84 : vector<1x128xf32>
    %87 = arith.subf %85, %86 : vector<1x128xf32>
    %88 = vector.broadcast %84 : vector<1x128xf32> to vector<34x128xf32>
    %89 = arith.mulf %64, %88 : vector<34x128xf32>
    %90 = vector.broadcast %87 : vector<1x128xf32> to vector<34x128xf32>
    %91 = arith.addf %89, %90 : vector<34x128xf32>
    %cst_60 = arith.constant 0.000000e+00 : f32
    %92 = vector.broadcast %cst_60 : f32 to vector<34x128xf32>
    %93 = arith.maximumf %91, %92 : vector<34x128xf32>
    %c0_61 = arith.constant 0 : index
    %c0_62 = arith.constant 0 : index
    %94 = vector.load %arg9[%c0_61, %c0_62] : memref<34x128xf32, #tpu.memory_space<vmem>>, vector<34x128xf32>
    tpu.vector_store %arg9[%c0_61, %c0_62], %93 {strides = array<i32>} : memref<34x128xf32, #tpu.memory_space<vmem>>, vector<34x128xf32>,
    %95 = vector.extract_strided_slice %93 {offsets = [0, 0], sizes = [1, 128], strides = [1, 1]} : vector<34x128xf32> to vector<1x128xf32>
    %96 = vector.extract_strided_slice %93 {offsets = [1, 0], sizes = [1, 128], strides = [1, 1]} : vector<34x128xf32> to vector<1x128xf32>
    %97 = arith.maximumf %95, %96 : vector<1x128xf32>
    %98 = vector.extract_strided_slice %93 {offsets = [2, 0], sizes = [1, 128], strides = [1, 1]} : vector<34x128xf32> to vector<1x128xf32>
    %99 = vector.extract_strided_slice %93 {offsets = [3, 0], sizes = [1, 128], strides = [1, 1]} : vector<34x128xf32> to vector<1x128xf32>
    %100 = arith.maximumf %98, %99 : vector<1x128xf32>
    %101 = vector.extract_strided_slice %93 {offsets = [4, 0], sizes = [1, 128], strides = [1, 1]} : vector<34x128xf32> to vector<1x128xf32>
    %102 = vector.extract_strided_slice %93 {offsets = [5, 0], sizes = [1, 128], strides = [1, 1]} : vector<34x128xf32> to vector<1x128xf32>
    %103 = arith.maximumf %101, %102 : vector<1x128xf32>
    %104 = vector.extract_strided_slice %93 {offsets = [6, 0], sizes = [1, 128], strides = [1, 1]} : vector<34x128xf32> to vector<1x128xf32>
    %105 = vector.extract_strided_slice %93 {offsets = [7, 0], sizes = [1, 128], strides = [1, 1]} : vector<34x128xf32> to vector<1x128xf32>
    %106 = arith.maximumf %104, %105 : vector<1x128xf32>
    %107 = vector.extract_strided_slice %93 {offsets = [8, 0], sizes = [1, 128], strides = [1, 1]} : vector<34x128xf32> to vector<1x128xf32>
    %108 = vector.extract_strided_slice %93 {offsets = [9, 0], sizes = [1, 128], strides = [1, 1]} : vector<34x128xf32> to vector<1x128xf32>
    %109 = arith.maximumf %107, %108 : vector<1x128xf32>
    %110 = vector.extract_strided_slice %93 {offsets = [10, 0], sizes = [1, 128], strides = [1, 1]} : vector<34x128xf32> to vector<1x128xf32>
    %111 = vector.extract_strided_slice %93 {offsets = [11, 0], sizes = [1, 128], strides = [1, 1]} : vector<34x128xf32> to vector<1x128xf32>
    %112 = arith.maximumf %110, %111 : vector<1x128xf32>
    %113 = vector.extract_strided_slice %93 {offsets = [12, 0], sizes = [1, 128], strides = [1, 1]} : vector<34x128xf32> to vector<1x128xf32>
    %114 = vector.extract_strided_slice %93 {offsets = [13, 0], sizes = [1, 128], strides = [1, 1]} : vector<34x128xf32> to vector<1x128xf32>
    %115 = arith.maximumf %113, %114 : vector<1x128xf32>
    %116 = vector.extract_strided_slice %93 {offsets = [14, 0], sizes = [1, 128], strides = [1, 1]} : vector<34x128xf32> to vector<1x128xf32>
    %117 = vector.extract_strided_slice %93 {offsets = [15, 0], sizes = [1, 128], strides = [1, 1]} : vector<34x128xf32> to vector<1x128xf32>
    %118 = arith.maximumf %116, %117 : vector<1x128xf32>
    %119 = vector.extract_strided_slice %93 {offsets = [18, 0], sizes = [1, 128], strides = [1, 1]} : vector<34x128xf32> to vector<1x128xf32>
    %120 = vector.extract_strided_slice %93 {offsets = [19, 0], sizes = [1, 128], strides = [1, 1]} : vector<34x128xf32> to vector<1x128xf32>
    %121 = arith.maximumf %119, %120 : vector<1x128xf32>
    %122 = vector.extract_strided_slice %93 {offsets = [20, 0], sizes = [1, 128], strides = [1, 1]} : vector<34x128xf32> to vector<1x128xf32>
    %123 = vector.extract_strided_slice %93 {offsets = [21, 0], sizes = [1, 128], strides = [1, 1]} : vector<34x128xf32> to vector<1x128xf32>
    %124 = arith.maximumf %122, %123 : vector<1x128xf32>
    %125 = vector.extract_strided_slice %93 {offsets = [22, 0], sizes = [1, 128], strides = [1, 1]} : vector<34x128xf32> to vector<1x128xf32>
    %126 = vector.extract_strided_slice %93 {offsets = [23, 0], sizes = [1, 128], strides = [1, 1]} : vector<34x128xf32> to vector<1x128xf32>
    %127 = arith.maximumf %125, %126 : vector<1x128xf32>
    %128 = vector.extract_strided_slice %93 {offsets = [24, 0], sizes = [1, 128], strides = [1, 1]} : vector<34x128xf32> to vector<1x128xf32>
    %129 = vector.extract_strided_slice %93 {offsets = [25, 0], sizes = [1, 128], strides = [1, 1]} : vector<34x128xf32> to vector<1x128xf32>
    %130 = arith.maximumf %128, %129 : vector<1x128xf32>
    %131 = vector.extract_strided_slice %93 {offsets = [26, 0], sizes = [1, 128], strides = [1, 1]} : vector<34x128xf32> to vector<1x128xf32>
    %132 = vector.extract_strided_slice %93 {offsets = [27, 0], sizes = [1, 128], strides = [1, 1]} : vector<34x128xf32> to vector<1x128xf32>
    %133 = arith.maximumf %131, %132 : vector<1x128xf32>
    %134 = vector.extract_strided_slice %93 {offsets = [28, 0], sizes = [1, 128], strides = [1, 1]} : vector<34x128xf32> to vector<1x128xf32>
    %135 = vector.extract_strided_slice %93 {offsets = [29, 0], sizes = [1, 128], strides = [1, 1]} : vector<34x128xf32> to vector<1x128xf32>
    %136 = arith.maximumf %134, %135 : vector<1x128xf32>
    %137 = vector.extract_strided_slice %93 {offsets = [30, 0], sizes = [1, 128], strides = [1, 1]} : vector<34x128xf32> to vector<1x128xf32>
    %138 = vector.extract_strided_slice %93 {offsets = [31, 0], sizes = [1, 128], strides = [1, 1]} : vector<34x128xf32> to vector<1x128xf32>
    %139 = arith.maximumf %137, %138 : vector<1x128xf32>
    %140 = vector.extract_strided_slice %93 {offsets = [32, 0], sizes = [1, 128], strides = [1, 1]} : vector<34x128xf32> to vector<1x128xf32>
    %141 = vector.extract_strided_slice %93 {offsets = [33, 0], sizes = [1, 128], strides = [1, 1]} : vector<34x128xf32> to vector<1x128xf32>
    %142 = arith.maximumf %140, %141 : vector<1x128xf32>
    %143 = tpu.concatenate %97, %100, %103, %106, %109, %112, %115, %118, %121, %124, %127, %130, %133, %136, %139, %142 in 0 : vector<1x128xf32>, vector<1x128xf32>, vector<1x128xf32>, vector<1x128xf32>, vector<1x128xf32>, vector<1x128xf32>, vector<1x128xf32>, vector<1x128xf32>, vector<1x128xf32>, vector<1x128xf32>, vector<1x128xf32>, vector<1x128xf32>, vector<1x128xf32>, vector<1x128xf32>, vector<1x128xf32>, vector<1x128xf32> -> vector<16x128xf32>
    %c0_63 = arith.constant 0 : index
    %c0_64 = arith.constant 0 : index
    %144 = vector.load %arg10[%c0_63, %c0_64] : memref<16x128xf32, #tpu.memory_space<vmem>>, vector<16x128xf32>
    tpu.vector_store %arg10[%c0_63, %c0_64], %143 {strides = array<i32>} : memref<16x128xf32, #tpu.memory_space<vmem>>, vector<16x128xf32>,
    return
  }
  func.func @transform_0(%arg0: i32) -> (i32, i32) {
    %c0_i32 = arith.constant 0 : i32
    %c0_i32_0 = arith.constant 0 : i32
    %c0_i32_1 = arith.constant 0 : i32
    return %c0_i32, %c0_i32_0 : i32, i32
  }
  func.func @transform_1(%arg0: i32) -> (i32, i32, i32) {
    %c0_i32 = arith.constant 0 : i32
    %c0_i32_0 = arith.constant 0 : i32
    %c0_i32_1 = arith.constant 0 : i32
    %c0_i32_2 = arith.constant 0 : i32
    return %c0_i32, %c0_i32_0, %c0_i32_1 : i32, i32, i32
  }
  func.func @transform_2(%arg0: i32) -> (i32, i32) {
    %c0_i32 = arith.constant 0 : i32
    %c0_i32_0 = arith.constant 0 : i32
    %c0_i32_1 = arith.constant 0 : i32
    return %c0_i32, %c0_i32_0 : i32, i32
  }
  func.func @transform_3(%arg0: i32) -> (i32, i32) {
    %c0_i32 = arith.constant 0 : i32
    %c0_i32_0 = arith.constant 0 : i32
    %c0_i32_1 = arith.constant 0 : i32
    return %c0_i32, %c0_i32_0 : i32, i32
  }
  func.func @transform_4(%arg0: i32) -> (i32, i32, i32) {
    %c0_i32 = arith.constant 0 : i32
    %c0_i32_0 = arith.constant 0 : i32
    %c0_i32_1 = arith.constant 0 : i32
    %c0_i32_2 = arith.constant 0 : i32
    return %c0_i32, %c0_i32_0, %c0_i32_1 : i32, i32, i32
  }
  func.func @transform_5(%arg0: i32) -> (i32, i32) {
    %c0_i32 = arith.constant 0 : i32
    %c0_i32_0 = arith.constant 0 : i32
    %c0_i32_1 = arith.constant 0 : i32
    return %c0_i32, %c0_i32_0 : i32, i32
  }
  func.func @transform_6(%arg0: i32) -> (i32, i32) {
    %c0_i32 = arith.constant 0 : i32
    %c0_i32_0 = arith.constant 0 : i32
    %c0_i32_1 = arith.constant 0 : i32
    return %c0_i32, %c0_i32_0 : i32, i32
  }
  func.func @transform_7(%arg0: i32) -> (i32, i32) {
    %c0_i32 = arith.constant 0 : i32
    %c0_i32_0 = arith.constant 0 : i32
    %c0_i32_1 = arith.constant 0 : i32
    return %c0_i32, %c0_i32_0 : i32, i32
  }
  func.func @transform_8(%arg0: i32) -> (i32, i32) {
    %c0_i32 = arith.constant 0 : i32
    %c0_i32_0 = arith.constant 0 : i32
    %c0_i32_1 = arith.constant 0 : i32
    return %c0_i32, %c0_i32_0 : i32, i32
  }
  func.func @transform_9(%arg0: i32) -> (i32, i32) {
    %c0_i32 = arith.constant 0 : i32
    %c0_i32_0 = arith.constant 0 : i32
    %c0_i32_1 = arith.constant 0 : i32
    return %c0_i32, %c0_i32_0 : i32, i32
  }
}

</mosaic_0001>

<bundles_post_ra>
// kernel: tpu_custom_call.1
= control target key start
LH: loop header
LB: loop body
LE: loop exit
PB: predicated region body
PF: predicated region fallthrough
CT: control target
= control target key end

     0   :  { %15 = vsyncpa [#allocation4], 0  ;;  %s1196_s0 = inlined_call_operand.vmem [shape: f32[36,128], index: 0, kind: input, shape index: {}]   ;;  %s1197_s1 = inlined_call_operand.hbm [shape: f32[3,128,128], index: 1, kind: input, shape index: {}]   ;;  %s1198_s2 = inlined_call_operand.vmem [shape: f32[1,128], index: 2, kind: input, shape index: {}]   ;;  %s1199_s3 = inlined_call_operand.vmem [shape: f32[1,128], index: 3, kind: input, shape index: {}]   ;;  %s1200_s4 = inlined_call_operand.hbm [shape: f32[3,128,128], index: 4, kind: input, shape index: {}]   ;;  %s1201_s5 = inlined_call_operand.vmem [shape: f32[1,128], index: 5, kind: input, shape index: {}]   ;;  %s1202_s6 = inlined_call_operand.vmem [shape: f32[1,128], index: 6, kind: input, shape index: {}]   ;;  %s1203_s7 = inlined_call_operand.vmem [shape: f32[34,1], index: 7, kind: input, shape index: {}]   ;;  %s1204_s8 = inlined_call_operand.hbm [shape: f32[34,128], index: 8, kind: output, shape index: {0}]   ;;  %s1205_s9 = inlined_call_operand.hbm [shape: f32[16,128], index: 9, kind: output, shape index: {1}]  }
   0x1   :  { %16 = vsyncpa [#allocation7], 0 }
   0x2   :  { %17 = vsyncpa [#allocation5], 0 }
   0x3   :  { %18 = vsyncpa [#allocation10], 0  ;;  %s25_s11 = sshll.u32 %s1197_s1, 4  ;;  %s881_s12 = smov [#allocation3]   ;;  %s26_s11 = int_to_ptr.hbm [resolvable:$true] %s25_s11 }
   0x4   :  { %s27_s13 = sshll.u32 %s881_s12, 4  ;;  %s42_s16 = sshll.u32 %s1200_s4, 4  ;;  %s28_s13 = int_to_ptr.vmem [resolvable:$true] %s27_s13  ;;  %s43_s16 = int_to_ptr.hbm [resolvable:$true] %s42_s16 }
   0x5   :  { %s882_s17 = smov 128   ;;  %s883_s18 = smov 8  }
   0x6   :  { %33 = dma.hbm_to_vmem [thread:$0]  %s26_s11, 6144, %s28_s13, [#allocation4], %s882_s17, %s882_s17, %s883_s18  }
   0x7   :  { %s884_s19 = smov [#allocation6]  }
   0x8   :  { %s44_s20 = sshll.u32 %s884_s19, 4  ;;  %s45_s20 = int_to_ptr.vmem [resolvable:$true] %s44_s20 }
   0x9   :  { %50 = dma.hbm_to_vmem [thread:$0]  %s43_s16, 6144, %s45_s20, [#allocation7], %s882_s17, %s882_s17, %s883_s18  }
   0xa   :  { %873 = dma.done.wait [#allocation4], 6144  }
   0xb   :  { %874 = vsyncadd [#allocation4], 4294961152 }
   0xc   :  { %875 = dma.done.wait [#allocation7], 6144  }
   0xd   :  { %876 = vsyncadd [#allocation7], 4294961152  ;;  %v198_v0 = vld [vmem:[#allocation3 + $0x178] sm:$0xff]  ;;  %v197_v1 = vld [vmem:[#allocation3 + $0x170] sm:$0xff]  ;;  %v885_v32 = vmov 0   ;;  %vm269_vm0 = vcmask 1041408  }
   0xe   :  { %v112_v2 = vld [vmem:[#allocation3 + $0xf8] sm:$0xff]  ;;  %199 = vmatpush.msra.mxu2 %v198_v0  ;;  %v111_v4 = vld [vmem:[#allocation3 + $0xf0] sm:$0xff]  ;;  %v196_v5 = vld [vmem:[#allocation3 + $0x168] sm:$0xff]  ;;  %768 = vset.pattern.permute.xlu0 %v885_v32  ;;  %s695_s23 = sshll.u32 %s1204_s8, 4  ;;  %vm667_vm8 = vcmask 1040384   ;;  %vm670_vm9 = vcmask 1042432   ;;  %s696_s23 = int_to_ptr.hbm [resolvable:$true] %s695_s23 }
   0xf   :  { %113 = vmatpush.msra.mxu0 %v112_v2  ;;  %v90_v3 = vld [vmem:[#allocation3 + $0x78] sm:$0xff]  ;;  %v89_v6 = vld [vmem:[#allocation3 + $0x70] sm:$0xff]  ;;  %v110_v7 = vld [vmem:[#allocation3 + $0xe8] sm:$0xff]  ;;  %769 = vset.pattern.permute.xlu1 %v885_v32  ;;  %vm672_vm10 = vcmask 1043456   ;;  %vm674_vm11 = vcmask 1044480   ;;  %vm676_vm12 = vcmask 1045504  }
  0x10   :  { %145 = vmatpush.msra.mxu1 %v90_v3  ;;  %200 = vmatpush.msra.mxu2 %v197_v1  ;;  %v88_v8 = vld [vmem:[#allocation3 + $0x68] sm:$0xff]  ;;  %v195_v9 = vld [vmem:[#allocation3 + $0x160] sm:$0xff]  ;;  %v194_v12 = vld [vmem:[#allocation3 + $0x158] sm:$0xff]  ;;  %vm678_vm13 = vcmask 1046528   ;;  %s889_s8 = smov [#allocation9]   ;;  %s708_s26 = sshll.u32 %s1205_s9, 4  ;;  %s709_s26 = int_to_ptr.hbm [resolvable:$true] %s708_s26 }
  0x11   :  { %114 = vmatpush.msra.mxu0 %v111_v4  ;;  %v109_v10 = vld [vmem:[#allocation3 + $0xe0] sm:$0xff]  ;;  %v108_v13 = vld [vmem:[#allocation3 + $0xd8] sm:$0xff]  ;;  %v193_v15 = vld [vmem:[#allocation3 + $0x150] sm:$0xff]  ;;  %770 = vset.pattern.permute.xlu2 %v885_v32  ;;  %s706_s24 = sshll.u32 %s889_s8, 4  ;;  %s707_s24 = int_to_ptr.vmem [resolvable:$true] %s706_s24 }
  0x12   :  { %146 = vmatpush.msra.mxu1 %v89_v6  ;;  %201 = vmatpush.msra.mxu2 %v196_v5  ;;  %v87_v11 = vld [vmem:[#allocation3 + $0x60] sm:$0xff]  ;;  %v86_v14 = vld [vmem:[#allocation3 + $0x58] sm:$0xff]  ;;  %v107_v16 = vld [vmem:[#allocation3 + $0xd0] sm:$0xff] }
  0x13   :  { %115 = vmatpush.msra.mxu0 %v110_v7  ;;  %v85_v17 = vld [vmem:[#allocation3 + $0x50] sm:$0xff]  ;;  %v192_v18 = vld [vmem:[#allocation3 + $0x148] sm:$0xff]  ;;  %v191_v21 = vld [vmem:[#allocation3 + $0x140] sm:$0xff] }
  0x14   :  { %147 = vmatpush.msra.mxu1 %v88_v8  ;;  %202 = vmatpush.msra.mxu2 %v195_v9  ;;  %v106_v19 = vld [vmem:[#allocation3 + $0xc8] sm:$0xff]  ;;  %v105_v22 = vld [vmem:[#allocation3 + $0xc0] sm:$0xff]  ;;  %v190_v24 = vld [vmem:[#allocation3 + $0x138] sm:$0xff] }
  0x15   :  { %116 = vmatpush.msra.mxu0 %v109_v10  ;;  %v84_v20 = vld [vmem:[#allocation3 + $0x48] sm:$0xff]  ;;  %v83_v23 = vld [vmem:[#allocation3 + $0x40] sm:$0xff]  ;;  %v104_v25 = vld [vmem:[#allocation3 + $0xb8] sm:$0xff] }
  0x16   :  { %148 = vmatpush.msra.mxu1 %v87_v11  ;;  %203 = vmatpush.msra.mxu2 %v194_v12  ;;  %v82_v26 = vld [vmem:[#allocation3 + $0x38] sm:$0xff]  ;;  %v189_v27 = vld [vmem:[#allocation3 + $0x130] sm:$0xff]  ;;  %v188_v30 = vld [vmem:[#allocation3 + $0x128] sm:$0xff] }
  0x17   :  { %117 = vmatpush.msra.mxu0 %v108_v13  ;;  %v103_v28 = vld [vmem:[#allocation3 + $0xb0] sm:$0xff]  ;;  %v102_v31 = vld [vmem:[#allocation3 + $0xa8] sm:$0xff]  ;;  %v65_v33 = vld [vmem:[%s1203_s7] sm:$0xff] }
  0x18   :  { %149 = vmatpush.msra.mxu1 %v86_v14  ;;  %204 = vmatpush.msra.mxu2 %v193_v15  ;;  %v81_v29 = vld [vmem:[#allocation3 + $0x30] sm:$0xff]  ;;  %v80_v34 = vld [vmem:[#allocation3 + $0x28] sm:$0xff]  ;;  %v187_v35 = vld [vmem:[#allocation3 + $0x120] sm:$0xff] }
  0x19   :  { %118 = vmatpush.msra.mxu0 %v107_v16  ;;  %v101_v36 = vld [vmem:[#allocation3 + $0xa0] sm:$0xff]  ;;  %238 = vperm.xlu0 %768, %v65_v33   ;;  %v186_v38 = vld [vmem:[#allocation3 + $0x118] sm:$0xff]  ;;  %v185_v41 = vld [vmem:[#allocation3 + $0x110] sm:$0xff] }
  0x1a   :  { %150 = vmatpush.msra.mxu1 %v85_v17  ;;  %205 = vmatpush.msra.mxu2 %v192_v18  ;;  %v79_v37 = vld [vmem:[#allocation3 + $0x20] sm:$0xff]  ;;  %v100_v39 = vld [vmem:[#allocation3 + $0x98] sm:$0xff]  ;;  %v99_v42 = vld [vmem:[#allocation3 + $0x90] sm:$0xff] }
  0x1b   :  { %119 = vmatpush.msra.mxu0 %v106_v19  ;;  %v78_v40 = vld [vmem:[#allocation3 + $0x18] sm:$0xff]  ;;  %v77_v43 = vld [vmem:[#allocation3 + $0x10] sm:$0xff]  ;;  %v66_v44 = vld [vmem:[%s1203_s7 + $0x8] sm:$0xff] }
  0x1c   :  { %151 = vmatpush.msra.mxu1 %v84_v20  ;;  %206 = vmatpush.msra.mxu2 %v191_v21  ;;  %v184_v45 = vld [vmem:[#allocation3 + $0x108] sm:$0xff]  ;;  %v183_v48 = vld [vmem:[#allocation3 + $0x100] sm:$0xff]  ;;  %v70_v53 = vld [vmem:[%s1196_s0] sm:$0xff] }
  0x1d   :  { %120 = vmatpush.msra.mxu0 %v105_v22  ;;  %v98_v46 = vld [vmem:[#allocation3 + $0x88] sm:$0xff]  ;;  %v97_v49 = vld [vmem:[#allocation3 + $0x80] sm:$0xff]  ;;  %v69_v55 = vld [vmem:[%s1203_s7 + $0x20] sm:$0x3] }
  0x1e   :  { %152 = vmatpush.msra.mxu1 %v83_v23  ;;  %207 = vmatpush.msra.mxu2 %v190_v24  ;;  %v76_v47 = vld [vmem:[#allocation3 + $0x8] sm:$0xff]  ;;  %v177_v50 = vld [vmem:[%s1196_s0 + $0x2] sm:$0xff]  ;;  %v68_v59 = vld [vmem:[%s1203_s7 + $0x18] sm:$0xff]  ;;  %v886_v24 = vmov 32.0  }
  0x1f   :  { %121 = vmatpush.msra.mxu0 %v104_v25  ;;  %v75_v51 = vld [vmem:[#allocation3] sm:$0xff]  ;;  %v67_v54 = vld [vmem:[%s1203_s7 + $0x10] sm:$0xff]  ;;  %258 = vperm.xlu2 %770, %v69_v55   ;;  %v180_v63 = vld [vmem:[%s1196_s0 + $0x1a] sm:$0xff]  ;;  %771 = vrcp.f32 %v886_v24 }
  0x20   :  { %153 = vmatpush.msra.mxu1 %v82_v26  ;;  %208 = vmatpush.msra.mxu2 %v189_v27  ;;  %v91_v52 = vld [vmem:[%s1196_s0 + $0x1] sm:$0xff]  ;;  %v178_v56 = vld [vmem:[%s1196_s0 + $0xa] sm:$0xff]  ;;  %v179_v60 = vld [vmem:[%s1196_s0 + $0x12] sm:$0xff] }
  0x21   :  { %122 = vmatpush.msra.mxu0 %v103_v28  ;;  %243 = vperm.xlu0 %768, %v66_v44   ;;  %v92_v57 = vld [vmem:[%s1196_s0 + $0x9] sm:$0xff]  ;;  %v93_v61 = vld [vmem:[%s1196_s0 + $0x11] sm:$0xff]  ;;  %v94_v0 = vld [vmem:[%s1196_s0 + $0x19] sm:$0xff] }
  0x22   :  { %154 = vmatpush.msra.mxu1 %v81_v29  ;;  %209 = vmatpush.msra.mxu2 %v188_v30  ;;  %v71_v58 = vld [vmem:[%s1196_s0 + $0x8] sm:$0xff]  ;;  %v72_v62 = vld [vmem:[%s1196_s0 + $0x10] sm:$0xff]  ;;  %v73_v1 = vld [vmem:[%s1196_s0 + $0x18] sm:$0xff] }
  0x23   :  { %123 = vmatpush.msra.mxu0 %v102_v31  ;;  %248 = vperm.xlu1 %769, %v67_v54   ;;  %v181_v2 = vld [vmem:[%s1196_s0 + $0x22] sm:$0x3]  ;;  %v74_v4 = vld [vmem:[%s1196_s0 + $0x20] sm:$0x3]  ;;  %v399_v24 = vld [vmem:[#allocation6 + $0xd0] sm:$0xff] }
  0x24   :  { %155 = vmatpush.msra.mxu1 %v80_v34  ;;  %210 = vmatpush.msra.mxu2 %v187_v35  ;;  %v95_v3 = vld [vmem:[%s1196_s0 + $0x21] sm:$0x3] }
  0x25   :  { %124 = vmatpush.msra.mxu0 %v101_v36  ;;  %v772_v34 = vpop.eup %771 }
  0x26   :  { %156 = vmatpush.msra.mxu1 %v79_v37  ;;  %211 = vmatpush.msra.mxu2 %v186_v38  ;;  %vm283_vm1 = vweird.f32 %v772_v34 }
  0x27   :  { %125 = vmatpush.msra.mxu0 %v100_v39 }
  0x28   :  { %157 = vmatpush.msra.mxu1 %v78_v40  ;;  %212 = vmatpush.msra.mxu2 %v185_v41 }
  0x29   :  { %126 = vmatpush.msra.mxu0 %v99_v42  ;;  %v279_v42 = vmul.f32 32.0, %v772_v34 }
  0x2a   :  { %158 = vmatpush.msra.mxu1 %v77_v43  ;;  %213 = vmatpush.msra.mxu2 %v184_v45 }
  0x2b   :  { %127 = vmatpush.msra.mxu0 %v98_v46  ;;  %253 = vperm.xlu1 %769, %v68_v59   ;;  %v280_v46 = vsub.f32 1.0, %v279_v42  ;;  %v404_v59 = vld [vmem:[#allocation6 + $0xf8] sm:$0xff] }
  0x2c   :  { %159 = vmatpush.msra.mxu1 %v76_v47  ;;  %214 = vmatpush.msra.mxu2 %v183_v48  ;;  %v378_v42 = vld [vmem:[#allocation6 + $0x58] sm:$0xff] }
  0x2d   :  { %128 = vmatpush.msra.mxu0 %v97_v49  ;;  %215 = vmatmul.f32.vlgmr.msra.gmra.mxu2 %v177_v50  ;;  %v281_v50 = vmul.f32 %v772_v34, %v280_v46  ;;  %v377_v46 = vld [vmem:[#allocation6 + $0x50] sm:$0xff] }
  0x2e   :  { %160 = vmatpush.msra.mxu1 %v75_v51  ;;  %129 = vmatmul.f32.vlgmr.msra.gmra.mxu0 %v91_v52 }
  0x2f   :  { %161 = vmatmul.f32.vlgmr.msra.gmra.mxu1 %v70_v53  ;;  %v282_v53 = vadd.f32 %v772_v34, %v281_v50  ;;  %405 = vmatpush.msra.mxu3 %v404_v59  ;;  %v376_v50 = vld [vmem:[#allocation6 + $0x48] sm:$0xff] }
  0x35   :  { %218 = vmatmul.f32.gmra.mxu2 %v178_v56  ;;  %v1043_v56 = vsel %vm283_vm1, %v772_v34, %v282_v53  ;;  %v398_v34 = vld [vmem:[#allocation6 + $0xc8] sm:$0xff] }
  0x36   :  { %132 = vmatmul.f32.gmra.mxu0 %v92_v57 }
  0x37   :  { %164 = vmatmul.f32.gmra.mxu1 %v71_v58 }
  0x3d   :  { %221 = vmatmul.f32.gmra.mxu2 %v179_v60 }
  0x3e   :  { %135 = vmatmul.f32.gmra.mxu0 %v93_v61 }
  0x3f   :  { %167 = vmatmul.f32.gmra.mxu1 %v72_v62 }
  0x45   :  { %224 = vmatmul.f32.gmra.mxu2 %v180_v63 }
  0x46   :  { %138 = vmatmul.f32.gmra.mxu0 %v94_v0 }
  0x47   :  { %170 = vmatmul.f32.gmra.mxu1 %v73_v1  ;;  %v403_v1 = vld [vmem:[#allocation6 + $0xf0] sm:$0xff] }
  0x48   :  { %406 = vmatpush.msra.mxu3 %v403_v1  ;;  %v1091_v1 = vld [vmem:[#allocation6 + $0x130] sm:$0xff] }
  0x4d   :  { %227 = vmatmul.f32.gmra.mxu2 %v181_v2 }
  0x4e   :  { %141 = vmatmul.f32.gmra.mxu0 %v95_v3 }
  0x4f   :  { %173 = vmatmul.f32.gmra.mxu1 %v74_v4 }
  0x79   :  { %v1036_v40 = vpop.permute.xlu2 %258 }
  0x8b   :  { %v1012_v13 = vpop.permute.xlu0 %238 }
  0x93   :  { %v1018_v25 = vpop.permute.xlu0 %243 }
  0x95   :  { %v1014_v15 = vpop.permute.xlu1 %248 }
  0x9d   :  { %v1028_v32 = vpop.permute.xlu1 %253 }
  0xab   :  { %v130_v5 = vpop.f32.mrf.mxu0 }
  0xac   :  { %v162_v6 = vpop.f32.mrf.mxu1 }
  0xad   :  { %v163_v19 = vadd.f32 %v162_v6, %v130_v5  ;;  %v402_v6 = vld [vmem:[#allocation6 + $0xe8] sm:$0xff] }
  0xae   :  { %407 = vmatpush.msra.mxu3 %v402_v6  ;;  %v390_v6 = vld [vmem:[#allocation6 + $0x88] sm:$0xff] }
  0xb0   :  { %v216_v7 = vpop.f32.mrf.mxu2 }
  0xb1   :  { %v1020_v26 = vadd.f32 %v216_v7, %v163_v19 }
  0xb3   :  { %v133_v8 = vpop.f32.mrf.mxu0  ;;  %v261_v35 = vmul.f32 %v1012_v13, %v1020_v26 }
  0xb4   :  { %v165_v9 = vpop.f32.mrf.mxu1 }
  0xb5   :  { %v166_v18 = vadd.f32 %v165_v9, %v133_v8 }
  0xb8   :  { %v219_v10 = vpop.f32.mrf.mxu2 }
  0xb9   :  { %v1016_v21 = vadd.f32 %v219_v10, %v166_v18  ;;  %v401_v10 = vld [vmem:[#allocation6 + $0xe0] sm:$0xff]  ;;  %v400_v18 = vld [vmem:[#allocation6 + $0xd8] sm:$0xff] }
  0xba   :  { %408 = vmatpush.msra.mxu3 %v401_v10  ;;  %v389_v10 = vld [vmem:[#allocation6 + $0x80] sm:$0xff] }
  0xbb   :  { %v136_v11 = vpop.f32.mrf.mxu0  ;;  %v262_v30 = vmul.f32 %v1018_v25, %v1016_v21 }
  0xbc   :  { %v168_v12 = vpop.f32.mrf.mxu1  ;;  %409 = vmatpush.msra.mxu3 %v400_v18  ;;  %v477_v18 = vld [vmem:[#allocation6 + $0x110] sm:$0xff] }
  0xbd   :  { %v169_v20 = vadd.f32 %v168_v12, %v136_v11  ;;  %v266_v37 = vadd.f32 %v262_v30, %v261_v35  ;;  %v380_v30 = vld [vmem:[#allocation6 + $0x68] sm:$0xff] }
  0xbe   :  { %410 = vmatpush.msra.mxu3 %v399_v24 }
  0xc0   :  { %v222_v14 = vpop.f32.mrf.mxu2  ;;  %411 = vmatpush.msra.mxu3 %v398_v34 }
  0xc1   :  { %v1022_v27 = vadd.f32 %v222_v14, %v169_v20 }
  0xc3   :  { %v139_v16 = vpop.f32.mrf.mxu0  ;;  %v263_v36 = vmul.f32 %v1014_v15, %v1022_v27 }
  0xc4   :  { %v171_v17 = vpop.f32.mrf.mxu1 }
  0xc5   :  { %v172_v22 = vadd.f32 %v171_v17, %v139_v16  ;;  %v267_v43 = vadd.f32 %v266_v37, %v263_v36  ;;  %v382_v16 = vld [vmem:[#allocation6 + $0x78] sm:$0xff]  ;;  %v379_v36 = vld [vmem:[#allocation6 + $0x60] sm:$0xff] }
  0xc6   :  { %v1063_v17 = vld [vmem:[#allocation6 + $0x178] sm:$0xff]  ;;  %437 = vmatpush.msrb.mxu0 %v382_v16  ;;  %727 = vmatpush.msrb.mxu2 %v382_v16  ;;  %v1073_v37 = vld [vmem:[#allocation6 + $0x160] sm:$0xff]  ;;  %v887_v16 = vmov 0.0  }
  0xc7   :  { %491 = vmatpush.msrb.mxu1 %v1063_v17  ;;  %355 = vst [vmem:[#allocation2] sm:$0x1] %v887_v16 }
  0xc8   :  { %v225_v23 = vpop.f32.mrf.mxu2  ;;  %356 = vst [vmem:[#allocation2 + $0x23] sm:$0x1] %v887_v16 }
  0xc9   :  { %v1026_v31 = vadd.f32 %v225_v23, %v172_v22  ;;  %v381_v22 = vld [vmem:[#allocation6 + $0x70] sm:$0xff] }
  0xca   :  { %v1066_v23 = vld [vmem:[#allocation6 + $0x170] sm:$0xff]  ;;  %438 = vmatpush.msrb.mxu0 %v381_v22  ;;  %728 = vmatpush.msrb.mxu2 %v381_v22  ;;  %v367_v22 = vld [vmem:[#allocation6] sm:$0xff] }
  0xcb   :  { %v142_v28 = vpop.f32.mrf.mxu0  ;;  %v264_v38 = vmul.f32 %v1028_v32, %v1026_v31  ;;  %492 = vmatpush.msrb.mxu1 %v1066_v23 }
  0xcc   :  { %v174_v29 = vpop.f32.mrf.mxu1  ;;  %439 = vmatpush.msrb.mxu0 %v380_v30  ;;  %729 = vmatpush.msrb.mxu2 %v380_v30 }
  0xcd   :  { %v175_v33 = vadd.f32 %v174_v29, %v142_v28  ;;  %v268_v45 = vadd.f32 %v267_v43, %v264_v38  ;;  %v397_v38 = vld [vmem:[#allocation6 + $0xc0] sm:$0xff]  ;;  %v1076_v43 = vld [vmem:[#allocation6 + $0x158] sm:$0xff] }
  0xce   :  { %440 = vmatpush.msrb.mxu0 %v379_v36  ;;  %730 = vmatpush.msrb.mxu2 %v379_v36 }
  0xcf   :  { %412 = vmatpush.msra.mxu3 %v397_v38 }
  0xd0   :  { %v228_v39 = vpop.f32.mrf.mxu2  ;;  %441 = vmatpush.msrb.mxu0 %v378_v42  ;;  %731 = vmatpush.msrb.mxu2 %v378_v42 }
  0xd1   :  { %v1038_v41 = vadd.f32 %v228_v39, %v175_v33  ;;  %v1070_v33 = vld [vmem:[#allocation6 + $0x168] sm:$0xff] }
  0xd2   :  { %493 = vmatpush.msrb.mxu1 %v1070_v33  ;;  %442 = vmatpush.msrb.mxu0 %v377_v46 }
  0xd3   :  { %v265_v44 = vmul.f32 %v1036_v40, %v1038_v41  ;;  %732 = vmatpush.msrb.mxu2 %v377_v46 }
  0xd4   :  { %494 = vmatpush.msrb.mxu1 %v1073_v37  ;;  %443 = vmatpush.msrb.mxu0 %v376_v50 }
  0xd5   :  { %v270_v47 = vsel %vm269_vm0, %v265_v44, 0.0  ;;  %v396_v44 = vld [vmem:[#allocation6 + $0xb8] sm:$0xff]  ;;  %733 = vmatpush.msrb.mxu2 %v376_v50 }
  0xd6   :  { %v271_v48 = vadd.f32 %v270_v47, %v268_v45  ;;  %495 = vmatpush.msrb.mxu1 %v1076_v43  ;;  %v1079_v47 = vld [vmem:[#allocation6 + $0x150] sm:$0xff]  ;;  %413 = vmatpush.msra.mxu3 %v396_v44 }
  0xd8   :  { %v272_v49 = vrot.slane %v271_v48, 4  ;;  %496 = vmatpush.msrb.mxu1 %v1079_v47 }
  0xda   :  { %v273_v51 = vadd.f32 %v272_v49, %v271_v48  ;;  %v395_v48 = vld [vmem:[#allocation6 + $0xb0] sm:$0xff] }
  0xdb   :  { %414 = vmatpush.msra.mxu3 %v395_v48 }
  0xdc   :  { %v274_v52 = vrot.slane %v273_v51, 2 }
  0xde   :  { %v275_v54 = vadd.f32 %v274_v52, %v273_v51  ;;  %v1082_v51 = vld [vmem:[#allocation6 + $0x148] sm:$0xff] }
  0xdf   :  { %v394_v52 = vld [vmem:[#allocation6 + $0xa8] sm:$0xff]  ;;  %497 = vmatpush.msrb.mxu1 %v1082_v51 }
  0xe0   :  { %v276_v55 = vrot.slane %v275_v54, 1  ;;  %415 = vmatpush.msra.mxu3 %v394_v52 }
  0xe2   :  { %v277_v57 = vadd.f32 %v276_v55, %v275_v54  ;;  %v375_v54 = vld [vmem:[#allocation6 + $0x40] sm:$0xff] }
  0xe3   :  { %v1085_v55 = vld [vmem:[#allocation6 + $0x140] sm:$0xff]  ;;  %444 = vmatpush.msrb.mxu0 %v375_v54  ;;  %734 = vmatpush.msrb.mxu2 %v375_v54 }
  0xe4   :  { %v1046_v58 = vmul.f32 %v1043_v56, %v277_v57  ;;  %v393_v57 = vld [vmem:[#allocation6 + $0xa0] sm:$0xff]  ;;  %498 = vmatpush.msrb.mxu1 %v1085_v55 }
  0xe5   :  { %416 = vmatpush.msra.mxu3 %v393_v57 }
  0xe6   :  { %v286_v60 = vsub.f32 %v1020_v26, %v1046_v58  ;;  %v287_v61 = vsub.f32 %v1016_v21, %v1046_v58  ;;  %v288_v62 = vsub.f32 %v1022_v27, %v1046_v58  ;;  %v289_v63 = vsub.f32 %v1026_v31, %v1046_v58 }
  0xe7   :  { %v290_v0 = vsub.f32 %v1038_v41, %v1046_v58 }
  0xe8   :  { %v291_v2 = vmul.f32 %v286_v60, %v1012_v13  ;;  %v292_v3 = vmul.f32 %v287_v61, %v1018_v25  ;;  %v293_v4 = vmul.f32 %v288_v62, %v1014_v15  ;;  %v294_v7 = vmul.f32 %v289_v63, %v1028_v32  ;;  %v374_v60 = vld [vmem:[#allocation6 + $0x38] sm:$0xff] }
  0xe9   :  { %v295_v5 = vmul.f32 %v290_v0, %v1036_v40  ;;  %v1088_v61 = vld [vmem:[#allocation6 + $0x138] sm:$0xff]  ;;  %445 = vmatpush.msrb.mxu0 %v374_v60  ;;  %735 = vmatpush.msrb.mxu2 %v374_v60  ;;  %v373_v0 = vld [vmem:[#allocation6 + $0x30] sm:$0xff] }
  0xea   :  { %v296_v8 = vmul.f32 %v291_v2, %v291_v2  ;;  %v297_v9 = vmul.f32 %v292_v3, %v292_v3  ;;  %v298_v11 = vmul.f32 %v293_v4, %v293_v4  ;;  %v299_v19 = vmul.f32 %v294_v7, %v294_v7  ;;  %v392_v62 = vld [vmem:[#allocation6 + $0x98] sm:$0xff]  ;;  %499 = vmatpush.msrb.mxu1 %v1088_v61  ;;  %v391_v2 = vld [vmem:[#allocation6 + $0x90] sm:$0xff]  ;;  %v372_v4 = vld [vmem:[#allocation6 + $0x28] sm:$0xff] }
  0xeb   :  { %v300_v14 = vmul.f32 %v295_v5, %v295_v5  ;;  %417 = vmatpush.msra.mxu3 %v392_v62  ;;  %446 = vmatpush.msrb.mxu0 %v373_v0  ;;  %v1095_v5 = vld [vmem:[#allocation6 + $0x128] sm:$0xff] }
  0xec   :  { %v301_v12 = vadd.f32 %v297_v9, %v296_v8  ;;  %736 = vmatpush.msrb.mxu2 %v373_v0  ;;  %500 = vmatpush.msrb.mxu1 %v1091_v1  ;;  %v371_v8 = vld [vmem:[#allocation6 + $0x20] sm:$0xff] }
  0xed   :  { %v304_v29 = vsel %vm269_vm0, %v300_v14, 0.0  ;;  %418 = vmatpush.msra.mxu3 %v391_v2  ;;  %447 = vmatpush.msrb.mxu0 %v372_v4  ;;  %v1098_v9 = vld [vmem:[#allocation6 + $0x120] sm:$0xff]  ;;  %v369_v14 = vld [vmem:[#allocation6 + $0x10] sm:$0xff] }
  0xee   :  { %v302_v20 = vadd.f32 %v301_v12, %v298_v11  ;;  %737 = vmatpush.msrb.mxu2 %v372_v4  ;;  %501 = vmatpush.msrb.mxu1 %v1095_v5  ;;  %v370_v11 = vld [vmem:[#allocation6 + $0x18] sm:$0xff] }
  0xef   :  { %419 = vmatpush.msra.mxu3 %v390_v6  ;;  %448 = vmatpush.msrb.mxu0 %v371_v8  ;;  %v478_v12 = vld [vmem:[#allocation6 + $0x118] sm:$0xff] }
  0xf0   :  { %v303_v28 = vadd.f32 %v302_v20, %v299_v19  ;;  %738 = vmatpush.msrb.mxu2 %v371_v8  ;;  %502 = vmatpush.msrb.mxu1 %v1098_v9  ;;  %v368_v19 = vld [vmem:[#allocation6 + $0x8] sm:$0xff] }
  0xf1   :  { %420 = vmatpush.msra.mxu3 %v389_v10  ;;  %449 = vmatpush.msrb.mxu0 %v370_v11  ;;  %v476_v20 = vld [vmem:[#allocation6 + $0x108] sm:$0xff] }
  0xf2   :  { %v305_v35 = vadd.f32 %v304_v29, %v303_v28  ;;  %739 = vmatpush.msrb.mxu2 %v370_v11  ;;  %503 = vmatpush.msrb.mxu1 %v478_v12  ;;  %v475_v28 = vld [vmem:[#allocation6 + $0x100] sm:$0xff] }
  0xf3   :  { %743 = vmatpush.msrb.mxu3 %v1063_v17  ;;  %450 = vmatpush.msrb.mxu0 %v369_v14 }
  0xf4   :  { %v306_v39 = vrot.slane %v305_v35, 4  ;;  %740 = vmatpush.msrb.mxu2 %v369_v14  ;;  %504 = vmatpush.msrb.mxu1 %v477_v18 }
  0xf5   :  { %744 = vmatpush.msrb.mxu3 %v1066_v23  ;;  %451 = vmatpush.msrb.mxu0 %v368_v19  ;;  %v313_v23 = vld [vmem:[%s1198_s2] sm:$0x1] }
  0xf6   :  { %v307_v45 = vadd.f32 %v306_v39, %v305_v35  ;;  %741 = vmatpush.msrb.mxu2 %v368_v19  ;;  %505 = vmatpush.msrb.mxu1 %v476_v20 }
  0xf7   :  { %745 = vmatpush.msrb.mxu3 %v1070_v33  ;;  %452 = vmatpush.msrb.mxu0 %v367_v22 }
  0xf8   :  { %v308_v49 = vrot.slane %v307_v45, 2  ;;  %742 = vmatpush.msrb.mxu2 %v367_v22  ;;  %506 = vmatpush.msrb.mxu1 %v475_v28 }
  0xf9   :  { %746 = vmatpush.msrb.mxu3 %v1073_v37  ;;  %v326_v37 = vld [vmem:[%s1199_s3] sm:$0x1] }
  0xfa   :  { %v309_v53 = vadd.f32 %v308_v49, %v307_v45 }
  0xfb   :  { %747 = vmatpush.msrb.mxu3 %v1076_v43 }
  0xfc   :  { %v310_v59 = vrot.slane %v309_v53, 1 }
  0xfd   :  { %748 = vmatpush.msrb.mxu3 %v1079_v47 }
  0xfe   :  { %v311_v63 = vadd.f32 %v310_v59, %v309_v53 }
  0xff   :  { %749 = vmatpush.msrb.mxu3 %v1082_v51 }
 0x100   :  { %v312_v3 = vmul.f32 %v311_v63, %v1043_v56 }
 0x101   :  { %750 = vmatpush.msrb.mxu3 %v1085_v55 }
 0x102   :  { %v314_v7 = vadd.f32 1e-05, %v312_v3 }
 0x103   :  { %751 = vmatpush.msrb.mxu3 %v1088_v61 }
 0x104   :  { %773 = vrsqrt.f32 %v314_v7  ;;  %vm321_vm3 = vweird.f32 %v314_v7 }
 0x105   :  { %752 = vmatpush.msrb.mxu3 %v1091_v1 }
 0x107   :  { %753 = vmatpush.msrb.mxu3 %v1095_v5 }
 0x109   :  { %754 = vmatpush.msrb.mxu3 %v1098_v9 }
 0x10a   :  { %v774_v24 = vpop.eup %773 }
 0x10b   :  { %v316_v29 = vmul.f32 %v774_v24, %v314_v7  ;;  %vm322_vm2 = vweird.f32 %v774_v24  ;;  %755 = vmatpush.msrb.mxu3 %v478_v12 }
 0x10c   :  { %vm323_vm4 = vmor %vm321_vm3, %vm322_vm2 }
 0x10d   :  { %v317_v30 = vmul.f32 %v774_v24, %v316_v29  ;;  %756 = vmatpush.msrb.mxu3 %v477_v18 }
 0x10f   :  { %v318_v17 = vmul.f32 0.5, %v317_v30  ;;  %757 = vmatpush.msrb.mxu3 %v476_v20 }
 0x111   :  { %v319_v34 = vsub.f32 1.5, %v318_v17  ;;  %758 = vmatpush.msrb.mxu3 %v475_v28 }
 0x113   :  { %v320_v35 = vmul.f32 %v774_v24, %v319_v34 }
 0x115   :  { %v324_v33 = vsel %vm323_vm4, %v774_v24, %v320_v35 }
 0x116   :  { %v325_v36 = vmul.f32 %v324_v33, %v313_v23 }
 0x118   :  { %v327_v38 = vmul.f32 %v325_v36, %v1046_v58  ;;  %v330_v39 = vperm.slane %v325_v36, 0 }
 0x11a   :  { %v328_v42 = vsub.f32 %v326_v37, %v327_v38  ;;  %v332_v43 = vmul.f32 %v330_v39, %v1020_v26  ;;  %v333_v44 = vmul.f32 %v330_v39, %v1016_v21  ;;  %v334_v45 = vmul.f32 %v330_v39, %v1022_v27 }
 0x11b   :  { %v335_v46 = vmul.f32 %v330_v39, %v1026_v31  ;;  %v336_v48 = vmul.f32 %v330_v39, %v1038_v41 }
 0x11c   :  { %v338_v47 = vperm.slane %v328_v42, 0 }
 0x11e   :  { %v340_v58 = vadd.f32 %v338_v47, %v332_v43  ;;  %v341_v49 = vadd.f32 %v338_v47, %v333_v44  ;;  %v342_v50 = vadd.f32 %v338_v47, %v334_v45  ;;  %v343_v51 = vadd.f32 %v338_v47, %v335_v46 }
 0x11f   :  { %v344_v52 = vadd.f32 %v338_v47, %v336_v48 }
 0x120   :  { %v345_v26 = vmax.f32 %v340_v58, 0.0  ;;  %v346_v53 = vmax.f32 %v341_v49, 0.0  ;;  %v347_v54 = vmax.f32 %v342_v50, 0.0  ;;  %v348_v55 = vmax.f32 %v343_v51, 0.0 }
 0x121   :  { %v349_v21 = vmax.f32 %v344_v52, 0.0 }
 0x122   :  { %v350_v27 = vmul.f32 %v345_v26, %v1012_v13  ;;  %v352_v31 = vmul.f32 %v347_v54, %v1014_v15  ;;  %v353_v57 = vmul.f32 %v348_v55, %v1028_v32  ;;  %v351_v59 = vmul.f32 %v346_v53, %v1018_v25 }
 0x123   :  { %v354_v41 = vmul.f32 %v349_v21, %v1036_v40 }
 0x124   :  { %357 = vst [vmem:[#allocation2 + $0x1] sm:$0xff] %v350_v27  ;;  %421 = vmatmul.f32.vlgmr.msra.gmra.mxu3 %v350_v27 }
 0x125   :  { %361 = vst [vmem:[#allocation2 + $0x21] sm:$0x3] %v354_v41 }
 0x126   :  { %359 = vst [vmem:[#allocation2 + $0x11] sm:$0xff] %v352_v31 }
 0x127   :  { %360 = vst [vmem:[#allocation2 + $0x19] sm:$0xff] %v353_v57 }
 0x128   :  { %358 = vst [vmem:[#allocation2 + $0x9] sm:$0xff] %v351_v59 }
 0x12b   :  { %v362_v60 = vld [vmem:[#allocation2] sm:$0xff] }
 0x12c   :  { %453 = vmatmul.f32.vlgmr.msrb.gmra.mxu0 %v362_v60  ;;  %424 = vmatmul.f32.gmra.mxu3 %v351_v59  ;;  %v387_v4 = vld [vmem:[#allocation2 + $0x21] sm:$0x3] }
 0x12d   :  { %v473_v6 = vld [vmem:[#allocation2 + $0x22] sm:$0x3] }
 0x12e   :  { %v365_v61 = vld [vmem:[#allocation2 + $0x18] sm:$0xff]  ;;  %v366_v0 = vld [vmem:[#allocation2 + $0x20] sm:$0x3] }
 0x12f   :  { %462 = vmatmul.f32.vlgmr.msrb.gmra.mxu2 %v365_v61  ;;  %v469_v62 = vld [vmem:[#allocation2 + $0x2] sm:$0xff]  ;;  %v470_v1 = vld [vmem:[#allocation2 + $0xa] sm:$0xff]  ;;  %v471_v3 = vld [vmem:[#allocation2 + $0x12] sm:$0xff] }
 0x130   :  { %507 = vmatmul.f32.vlgmr.msrb.gmra.mxu1 %v469_v62  ;;  %v363_v63 = vld [vmem:[#allocation2 + $0x8] sm:$0xff]  ;;  %v364_v2 = vld [vmem:[#allocation2 + $0x10] sm:$0xff]  ;;  %v472_v5 = vld [vmem:[#allocation2 + $0x1a] sm:$0xff] }
 0x134   :  { %456 = vmatmul.f32.gmra.mxu0 %v363_v63  ;;  %427 = vmatmul.f32.gmra.mxu3 %v352_v31 }
 0x137   :  { %465 = vmatmul.f32.gmra.mxu2 %v366_v0 }
 0x138   :  { %510 = vmatmul.f32.gmra.mxu1 %v470_v1 }
 0x13c   :  { %459 = vmatmul.f32.gmra.mxu0 %v364_v2  ;;  %430 = vmatmul.f32.gmra.mxu3 %v353_v57 }
 0x140   :  { %513 = vmatmul.f32.gmra.mxu1 %v471_v3 }
 0x144   :  { %433 = vmatmul.f32.gmra.mxu3 %v387_v4 }
 0x14c   :  { %516 = vmatmul.f32.vlgmr.msrb.gmra.mxu3 %v472_v5 }
 0x154   :  { %519 = vmatmul.f32.gmra.mxu3 %v473_v6 }
 0x1a7   :  { %v422_v7 = vpop.f32.mrf.mxu3 }
 0x1a9   :  { %v454_v9 = vpop.f32.mrf.mxu0 }
 0x1aa   :  { %v455_v24 = vadd.f32 %v454_v9, %v422_v7 }
 0x1ad   :  { %v508_v11 = vpop.f32.mrf.mxu1 }
 0x1ae   :  { %v1132_v34 = vadd.f32 %v508_v11, %v455_v24  ;;  %v572_v24 = vld [vmem:[%s1201_s5] sm:$0x1]  ;;  %s888_s5 = smov [#allocation8]  }
 0x1af   :  { %v425_v8 = vpop.f32.mrf.mxu3 }
 0x1b0   :  { %v528_v37 = vmul.f32 %v1132_v34, %v1012_v13 }
 0x1b1   :  { %v457_v14 = vpop.f32.mrf.mxu0 }
 0x1b2   :  { %v463_v20 = vpop.f32.mrf.mxu2  ;;  %v458_v22 = vadd.f32 %v457_v14, %v425_v8 }
 0x1b5   :  { %v511_v16 = vpop.f32.mrf.mxu1 }
 0x1b6   :  { %v1130_v29 = vadd.f32 %v511_v16, %v458_v22 }
 0x1b7   :  { %v428_v10 = vpop.f32.mrf.mxu3 }
 0x1b8   :  { %v529_v33 = vmul.f32 %v1130_v29, %v1018_v25 }
 0x1b9   :  { %v460_v19 = vpop.f32.mrf.mxu0 }
 0x1ba   :  { %v461_v28 = vadd.f32 %v460_v19, %v428_v10  ;;  %v466_v38 = vpop.f32.mrf.mxu2  ;;  %v533_v43 = vadd.f32 %v529_v33, %v528_v37 }
 0x1bd   :  { %v514_v17 = vpop.f32.mrf.mxu1 }
 0x1be   :  { %v1134_v23 = vadd.f32 %v514_v17, %v461_v28 }
 0x1bf   :  { %v431_v12 = vpop.f32.mrf.mxu3 }
 0x1c0   :  { %v464_v35 = vadd.f32 %v463_v20, %v431_v12  ;;  %v530_v39 = vmul.f32 %v1134_v23, %v1014_v15 }
 0x1c2   :  { %v534_v47 = vadd.f32 %v533_v43, %v530_v39 }
 0x1c7   :  { %v434_v18 = vpop.f32.mrf.mxu3 }
 0x1c8   :  { %v467_v42 = vadd.f32 %v466_v38, %v434_v18 }
 0x1cf   :  { %v517_v30 = vpop.f32.mrf.mxu3 }
 0x1d0   :  { %v1138_v36 = vadd.f32 %v517_v30, %v464_v35 }
 0x1d2   :  { %v531_v44 = vmul.f32 %v1138_v36, %v1028_v32 }
 0x1d4   :  { %v535_v58 = vadd.f32 %v534_v47, %v531_v44 }
 0x1d7   :  { %v520_v45 = vpop.f32.mrf.mxu3 }
 0x1d8   :  { %v527_v46 = vadd.f32 %v520_v45, %v467_v42 }
 0x1da   :  { %v532_v48 = vmul.f32 %v527_v46, %v1036_v40 }
 0x1dc   :  { %v536_v49 = vsel %vm269_vm0, %v532_v48, 0.0 }
 0x1dd   :  { %v537_v50 = vadd.f32 %v536_v49, %v535_v58 }
 0x1df   :  { %v538_v51 = vrot.slane %v537_v50, 4 }
 0x1e1   :  { %v539_v52 = vadd.f32 %v538_v51, %v537_v50 }
 0x1e3   :  { %v540_v26 = vrot.slane %v539_v52, 2 }
 0x1e5   :  { %v541_v53 = vadd.f32 %v540_v26, %v539_v52 }
 0x1e7   :  { %v542_v54 = vrot.slane %v541_v53, 1 }
 0x1e9   :  { %v543_v55 = vadd.f32 %v542_v54, %v541_v53 }
 0x1eb   :  { %v544_v21 = vmul.f32 %v543_v55, %v1043_v56 }
 0x1ed   :  { %v545_v27 = vsub.f32 %v1132_v34, %v544_v21  ;;  %v546_v31 = vsub.f32 %v1130_v29, %v544_v21  ;;  %v547_v41 = vsub.f32 %v1134_v23, %v544_v21  ;;  %v548_v57 = vsub.f32 %v1138_v36, %v544_v21 }
 0x1ee   :  { %v549_v59 = vsub.f32 %v527_v46, %v544_v21 }
 0x1ef   :  { %v550_v60 = vmul.f32 %v545_v27, %v1012_v13  ;;  %v551_v61 = vmul.f32 %v546_v31, %v1018_v25  ;;  %v552_v62 = vmul.f32 %v547_v41, %v1014_v15  ;;  %v553_v0 = vmul.f32 %v548_v57, %v1028_v32 }
 0x1f0   :  { %v554_v63 = vmul.f32 %v549_v59, %v1036_v40 }
 0x1f1   :  { %v555_v1 = vmul.f32 %v550_v60, %v550_v60  ;;  %v556_v2 = vmul.f32 %v551_v61, %v551_v61  ;;  %v557_v3 = vmul.f32 %v552_v62, %v552_v62  ;;  %v558_v6 = vmul.f32 %v553_v0, %v553_v0 }
 0x1f2   :  { %v559_v5 = vmul.f32 %v554_v63, %v554_v63 }
 0x1f3   :  { %v560_v4 = vadd.f32 %v556_v2, %v555_v1 }
 0x1f4   :  { %v563_v9 = vsel %vm269_vm0, %v559_v5, 0.0 }
 0x1f5   :  { %v561_v7 = vadd.f32 %v560_v4, %v557_v3 }
 0x1f7   :  { %v562_v8 = vadd.f32 %v561_v7, %v558_v6 }
 0x1f9   :  { %v564_v10 = vadd.f32 %v563_v9, %v562_v8 }
 0x1fb   :  { %v565_v13 = vrot.slane %v564_v10, 4 }
 0x1fd   :  { %v566_v11 = vadd.f32 %v565_v13, %v564_v10 }
 0x1ff   :  { %v567_v25 = vrot.slane %v566_v11, 2 }
 0x201   :  { %v568_v12 = vadd.f32 %v567_v25, %v566_v11 }
 0x203   :  { %v569_v15 = vrot.slane %v568_v12, 1 }
 0x205   :  { %v570_v14 = vadd.f32 %v569_v15, %v568_v12 }
 0x207   :  { %v571_v40 = vmul.f32 %v570_v14, %v1043_v56  ;;  %v585_v56 = vld [vmem:[%s1202_s6] sm:$0x1]  ;;  %s693_s6 = sshll.u32 %s888_s5, 4  ;;  %s694_s6 = int_to_ptr.vmem [resolvable:$true] %s693_s6 }
 0x209   :  { %v573_v32 = vadd.f32 1e-05, %v571_v40 }
 0x20b   :  { %775 = vrsqrt.f32 %v573_v32  ;;  %vm580_vm6 = vweird.f32 %v573_v32 }
 0x211   :  { %v776_v16 = vpop.eup %775 }
 0x212   :  { %v575_v18 = vmul.f32 %v776_v16, %v573_v32  ;;  %vm581_vm5 = vweird.f32 %v776_v16 }
 0x213   :  { %vm582_vm7 = vmor %vm580_vm6, %vm581_vm5 }
 0x214   :  { %v576_v19 = vmul.f32 %v776_v16, %v575_v18 }
 0x216   :  { %v577_v20 = vmul.f32 0.5, %v576_v19 }
 0x218   :  { %v578_v22 = vsub.f32 1.5, %v577_v20 }
 0x21a   :  { %v579_v28 = vmul.f32 %v776_v16, %v578_v22 }
 0x21c   :  { %v583_v30 = vsel %vm582_vm7, %v776_v16, %v579_v28 }
 0x21d   :  { %v584_v17 = vmul.f32 %v583_v30, %v572_v24 }
 0x21f   :  { %v586_v35 = vmul.f32 %v584_v17, %v544_v21  ;;  %v589_v33 = vperm.slane %v584_v17, 0 }
 0x221   :  { %v587_v37 = vsub.f32 %v585_v56, %v586_v35  ;;  %v595_v38 = vmul.f32 %v589_v33, %v527_v46  ;;  %v591_v42 = vmul.f32 %v589_v33, %v1132_v34  ;;  %v592_v43 = vmul.f32 %v589_v33, %v1130_v29 }
 0x222   :  { %v593_v44 = vmul.f32 %v589_v33, %v1134_v23  ;;  %v594_v45 = vmul.f32 %v589_v33, %v1138_v36 }
 0x223   :  { %v597_v39 = vperm.slane %v587_v37, 0 }
 0x225   :  { %v603_v47 = vadd.f32 %v597_v39, %v595_v38  ;;  %v599_v48 = vadd.f32 %v597_v39, %v591_v42  ;;  %v600_v58 = vadd.f32 %v597_v39, %v592_v43  ;;  %v601_v49 = vadd.f32 %v597_v39, %v593_v44 }
 0x226   :  { %v602_v50 = vadd.f32 %v597_v39, %v594_v45 }
 0x227   :  { %v608_v51 = vmax.f32 %v603_v47, 0.0  ;;  %v604_v52 = vmax.f32 %v599_v48, 0.0  ;;  %v605_v26 = vmax.f32 %v600_v58, 0.0  ;;  %v606_v53 = vmax.f32 %v601_v49, 0.0 }
 0x228   :  { %v607_v54 = vmax.f32 %v602_v50, 0.0 }
 0x229   :  { %613 = vst [vmem:[#allocation8 + $0x20] sm:$0x3] %v608_v51  ;;  %v615_v29 = vrot.slane %v604_v52, 1  ;;  %v623_v34 = vrot.slane %v606_v53, 1  ;;  %v619_v23 = vrot.slane %v605_v26, 1  ;;  %v631_v21 = vrot.slane %v608_v51, 1 }
 0x22a   :  { %609 = vst [vmem:[#allocation8] sm:$0xff] %v604_v52  ;;  %v627_v36 = vrot.slane %v607_v54, 1 }
 0x22b   :  { %610 = vst [vmem:[#allocation8 + $0x8] sm:$0xff] %v605_v26  ;;  %v617_v46 = vmax.f32 %v604_v52, %v615_v29  ;;  %v625_v55 = vmax.f32 %v606_v53, %v623_v34  ;;  %v621_v27 = vmax.f32 %v605_v26, %v619_v23  ;;  %v633_v62 = vmax.f32 %v608_v51, %v631_v21 }
 0x22c   :  { %611 = vst [vmem:[#allocation8 + $0x10] sm:$0xff] %v606_v53  ;;  %v629_v31 = vmax.f32 %v607_v54, %v627_v36 }
 0x22d   :  { %612 = vst [vmem:[#allocation8 + $0x18] sm:$0xff] %v607_v54  ;;  %v635_v41 = vrot.slane %v617_v46, 1  ;;  %v637_v57 = vrot.slane %v617_v46, 2  ;;  %v651_v59 = vrot.slane %v625_v55, 2  ;;  %v653_v60 = vrot.slane %v625_v55, 3 }
 0x22e   :  { %701 = dma.vmem_to_hbm [thread:$0]  %s694_s6, 640, %s696_s23, [#allocation5], %s882_s17, %s882_s17, %s883_s18   ;;  %v655_v61 = vrot.slane %v625_v55, 4  ;;  %v639_v63 = vrot.slane %v617_v46, 3  ;;  %v642_v1 = vrot.slane %v621_v27, 4  ;;  %v658_v2 = vrot.slane %v629_v31, 5 }
 0x22f   :  { %v668_v0 = vsel %vm667_vm8, %v617_v46, %v635_v41  ;;  %v680_v4 = vsel %vm667_vm8, %v651_v59, %v653_v60  ;;  %v644_v5 = vrot.slane %v621_v27, 5  ;;  %v660_v6 = vrot.slane %v629_v31, 6 }
 0x230   :  { %v669_v3 = vsel %vm269_vm0, %v668_v0, %v637_v57  ;;  %v681_v8 = vsel %vm269_vm0, %v680_v4, %v655_v61  ;;  %v646_v9 = vrot.slane %v621_v27, 6  ;;  %v662_v10 = vrot.slane %v629_v31, 7 }
 0x231   :  { %v671_v7 = vsel %vm670_vm9, %v669_v3, %v639_v63  ;;  %v682_v11 = vsel %vm670_vm9, %v681_v8, %v658_v2  ;;  %v648_v25 = vrot.slane %v621_v27, 7  ;;  %v665_v14 = vrot.slane %v633_v62, 1 }
 0x232   :  { %v673_v13 = vsel %vm672_vm10, %v671_v7, %v642_v1  ;;  %v683_v15 = vsel %vm672_vm10, %v682_v11, %v660_v6 }
 0x233   :  { %v675_v12 = vsel %vm674_vm11, %v673_v13, %v644_v5  ;;  %v684_v32 = vsel %vm674_vm11, %v683_v15, %v662_v10 }
 0x234   :  { %v677_v40 = vsel %vm676_vm12, %v675_v12, %v646_v9  ;;  %v685_v18 = vsel %vm676_vm12, %v684_v32, %v629_v31 }
 0x235   :  { %v679_v16 = vsel %vm678_vm13, %v677_v40, %v648_v25  ;;  %v686_v19 = vsel %vm678_vm13, %v685_v18, %v665_v14 }
 0x236   :  { %687 = vst [vmem:[#allocation9] sm:$0xff] %v679_v16 }
 0x237   :  { %688 = vst [vmem:[#allocation9 + $0x8] sm:$0xff] %v686_v19 }
 0x238   :  { %714 = dma.vmem_to_hbm [thread:$0]  %s707_s24, 256, %s709_s26, [#allocation10], %s882_s17, %s882_s17, %s883_s18  }
 0x239   :  { %877 = dma.done.wait [#allocation5], 640  }
 0x23a   :  { %878 = vsyncadd [#allocation5], 4294966656 }
 0x23b   :  { %879 = dma.done.wait [#allocation10], 256  }
 0x23c   :  { %880 = vsyncadd [#allocation10], 4294967040 }
 0x23d   :  { %723 = vsyncpa [#allocation4], 1 }
 0x23e   :  { %724 = vsyncpa [#allocation7], 1 }
 0x23f   :  { %725 = vsyncpa [#allocation5], 1 }
 0x240   :  { %726 = vsyncpa [#allocation10], 1 }

</bundles_post_ra>
